<compile_context>
chip_gen: v7x
topology: tpu7x:2x2x1
jax: 0.10.0
libtpu: 0.0.40
codegen_flags: <defaults>
</compile_context>

<pallas_src>
import functools

import jax
import jax.numpy as jnp
from jax.experimental import pallas as pl
from jax.experimental.pallas import tpu as pltpu


# ---------------------------------------------------------------------------
# Tile sizing
# ---------------------------------------------------------------------------
def _pick_tm(total_rows, per_row_vmem_bytes, itemsize, min_steps=4):
    """Pick the output tile height (block rows) for the 1-D grid."""
    sub = max(8, 32 // itemsize)  # sublane multiple (f32: 8, bf16: 16)
    if total_rows <= sub:
        return total_rows  # block equals full array dim -> always legal
    # Keep 2 outputs x 2 pipeline buffers (+ f32 intermediates) under ~8 MiB so
    # it fits the default scoped-VMEM limit on every generation (v5e 16 MiB
    # default scoped, v7x 64 MiB physical).
    budget = 8 * 1024 * 1024
    tm = min(total_rows, 4096, max(sub, budget // per_row_vmem_bytes))
    # Target >= min_steps grid steps: on v7x each of the 2 TensorCores then gets
    # >= 2 steps so the output double-buffer actually pipelines writeback.
    target = total_rows // min_steps
    if target >= sub:
        tm = min(tm, target)
    elif total_rows >= 2 * sub:
        tm = min(tm, max(sub, total_rows // 2))
    tm = max(sub, (tm // sub) * sub)
    return tm


# ---------------------------------------------------------------------------
# Lane-dense flat kernel: cache viewed as a (seq*dim//256, 256) slab (dim|256)
# ---------------------------------------------------------------------------
def _rope_flat_kernel(q_ref, freq_ref, expand_ref, cos_ref, sin_ref, *, ppr2):
    # q_ref:     (1, 128) int32  — per-lane position offset within an output row
    # freq_ref:  (1, 128) f32    — per-lane inv_freq (the dim/2 unique values,
    #                              tiled across the 256/dim positions of a row)
    # expand_ref:(128, 256) f32  — 0/1 matrix duplicating each unique lane into
    #                              the two halves of its dim-block (MXU gather)
    # cos_ref/sin_ref: (TM, 256) tiles of the flattened cache, consumer dtype.
    i = pl.program_id(0)
    tm = cos_ref.shape[0]
    row = jax.lax.broadcasted_iota(jnp.int32, (tm, 128), 0) + i * tm
    # Exact integer position, single f32 rounding in the multiply — matches the
    # PyTorch/JAX reference `t * inv_freq` bit-for-bit.
    pos = (row * ppr2 + q_ref[...]).astype(jnp.float32)
    emb = pos * freq_ref[...]                       # (tm, 128) unique values
    c = jnp.cos(emb)                                # half-width EUP work
    s = jnp.sin(emb)
    e = expand_ref[...]
    # MXU is otherwise idle; 0/1 expansion with HIGHEST precision is exact to
    # ~1e-7 and yields unmasked 256-lane stores.
    cos_ref[...] = jnp.dot(
        c, e, preferred_element_type=jnp.float32,
        precision=jax.lax.Precision.HIGHEST).astype(cos_ref.dtype)
    sin_ref[...] = jnp.dot(
        s, e, preferred_element_type=jnp.float32,
        precision=jax.lax.Precision.HIGHEST).astype(sin_ref.dtype)


@functools.partial(jax.jit, static_argnums=(1, 2, 3))
def _build_cache_flat(inv_freq, padded_seq, dim, out_dtype):
    half = dim // 2
    ppr2 = 256 // dim                       # positions per 256-lane output row
    rows = (padded_seq * dim) // 256        # slab rows
    itemsize = jnp.dtype(out_dtype).itemsize

    # Lane-constant vectors (hoisted out of the kernel body).
    u = jnp.arange(128, dtype=jnp.int32)
    q_lane = (u // half).reshape(1, 128)                       # position offset
    freq_lane = inv_freq[(u % half)].reshape(1, 128).astype(jnp.float32)
    l = jnp.arange(256, dtype=jnp.int32)
    u_of_l = (l // dim) * half + (l % dim) % half              # unique lane per out lane
    expand = (u_of_l[None, :] == u[:, None]).astype(jnp.float32)  # (128, 256)

    per_row = 4 * 256 * itemsize + 4096     # 2 outs x 2 bufs + f32 intermediates
    tm = _pick_tm(rows, per_row, itemsize)
    grid = (pl.cdiv(rows, tm),)
    kernel = functools.partial(_rope_flat_kernel, ppr2=ppr2)
    cos, sin = pl.pallas_call(
        kernel,
        out_shape=(
            jax.ShapeDtypeStruct((rows, 256), out_dtype),
            jax.ShapeDtypeStruct((rows, 256), out_dtype),
        ),
        grid_spec=pltpu.PrefetchScalarGridSpec(
            num_scalar_prefetch=0,
            grid=grid,
            in_specs=[
                pl.BlockSpec((1, 128), lambda i: (0, 0)),
                pl.BlockSpec((1, 128), lambda i: (0, 0)),
                pl.BlockSpec((128, 256), lambda i: (0, 0)),
            ],
            out_specs=(
                pl.BlockSpec((tm, 256), lambda i: (i, 0)),
                pl.BlockSpec((tm, 256), lambda i: (i, 0)),
            ),
        ),
        compiler_params=pltpu.CompilerParams(dimension_semantics=("parallel",)),
    )(q_lane, freq_lane, expand)
    # Free reshape (identical row-major bytes), fused inside this jit.
    return cos.reshape(padded_seq, dim), sin.reshape(padded_seq, dim)


# ---------------------------------------------------------------------------
# Rows-layout fallback kernel (dim does not divide 256)
# ---------------------------------------------------------------------------
def _rope_rows_kernel(inv_freq_ref, cos_ref, sin_ref):
    # inv_freq_ref: (1, dim//2) f32; cos_ref/sin_ref: (TM, dim) tiles.
    i = pl.program_id(0)
    tm = cos_ref.shape[0]
    half = inv_freq_ref.shape[1]
    t = (jax.lax.broadcasted_iota(jnp.int32, (tm, half), 0) + i * tm).astype(jnp.float32)
    freqs = t * inv_freq_ref[...]                 # (TM, dim//2) outer product
    c = jnp.cos(freqs)                            # half-width transcendentals
    s = jnp.sin(freqs)
    # TODO(synk): for dims that are not multiples of 128 this concat/store is
    # not lane-aligned (masked vst); emit a lane-padded slab if such dims matter.
    cos_ref[...] = jnp.concatenate([c, c], axis=-1).astype(cos_ref.dtype)
    sin_ref[...] = jnp.concatenate([s, s], axis=-1).astype(sin_ref.dtype)


@functools.partial(jax.jit, static_argnums=(1, 2, 3))
def _build_cache_rows(inv_freq_2d, seq_len, dim, out_dtype):
    itemsize = jnp.dtype(out_dtype).itemsize
    per_row = 4 * dim * itemsize + 16 * dim
    tm = _pick_tm(seq_len, per_row, itemsize)
    grid = (pl.cdiv(seq_len, tm),)
    cos, sin = pl.pallas_call(
        _rope_rows_kernel,
        out_shape=(
            jax.ShapeDtypeStruct((seq_len, dim), out_dtype),
            jax.ShapeDtypeStruct((seq_len, dim), out_dtype),
        ),
        grid_spec=pltpu.PrefetchScalarGridSpec(
            num_scalar_prefetch=0,
            grid=grid,
            in_specs=[pl.BlockSpec((1, dim // 2), lambda i: (0, 0))],
            out_specs=(
                pl.BlockSpec((tm, dim), lambda i: (i, 0)),
                pl.BlockSpec((tm, dim), lambda i: (i, 0)),
            ),
        ),
        compiler_params=pltpu.CompilerParams(dimension_semantics=("parallel",)),
    )(inv_freq_2d)
    return cos, sin


# ---------------------------------------------------------------------------
# Dispatcher
# ---------------------------------------------------------------------------
def _build_cos_sin_cache(inv_freq, seq_len, dim, out_dtype):
    """cos/sin caches in `out_dtype` (length >= seq_len, padded on flat path)."""
    out_dtype = jnp.dtype(out_dtype)
    inv_freq = inv_freq.astype(jnp.float32)
    if 2 <= dim <= 256 and 256 % dim == 0:
        ppr2 = 256 // dim
        padded_seq = ((seq_len + ppr2 - 1) // ppr2) * ppr2
        return _build_cache_flat(inv_freq, padded_seq, dim, out_dtype)
    return _build_cache_rows(inv_freq.reshape(1, dim // 2), seq_len, dim, out_dtype)


class InternLM2RotaryEmbedding:
    """JAX/Pallas port of the PyTorch InternLM2RotaryEmbedding module."""

    def __init__(self, dim, max_position_embeddings=2048, base=10000):
        self.dim = dim
        self.max_position_embeddings = max_position_embeddings
        self.base = base
        # inv_freq = 1 / base^(arange(0, dim, 2)/dim) — deterministic.
        self.inv_freq = 1.0 / (
            self.base ** (jnp.arange(0, self.dim, 2, dtype=jnp.float32) / self.dim)
        )
        self.max_seq_len_cached = max_position_embeddings
        # Caches are built lazily on first use, per consumer dtype, directly in
        # that dtype inside the kernel (no wrapper-side astype pass).
        self._full = {}    # dtype.name -> (cos_full, sin_full, cached_rows)
        self._views = {}   # (dtype.name, seq_len) -> (cos, sin) memoized trims

    def _get_full(self, dtype):
        key = dtype.name
        entry = self._full.get(key)
        if entry is None or entry[2] < self.max_seq_len_cached:
            cos, sin = _build_cos_sin_cache(
                self.inv_freq, self.max_seq_len_cached, self.dim, dtype
            )
            entry = (cos, sin, cos.shape[0])
            self._full[key] = entry
        return entry

    def __call__(self, x, seq_len=None):
        # NOTE: seq_len must be a concrete Python int (host-side cache logic).
        if seq_len is None:
            seq_len = self.max_seq_len_cached
        seq_len = int(seq_len)
        if seq_len > self.max_seq_len_cached:
            self.max_seq_len_cached = seq_len
        dtype = jnp.dtype(x.dtype)
        cos_full, sin_full, _ = self._get_full(dtype)
        if cos_full.shape[0] == seq_len:
            return cos_full, sin_full
        # Trim once per (dtype, seq_len) and memoize: repeated forward calls
        # return the same buffers instead of re-copying the cache in HBM.
        vkey = (dtype.name, seq_len)
        view = self._views.get(vkey)
        if view is None:
            view = (cos_full[:seq_len], sin_full[:seq_len])
            self._views[vkey] = view
        return view


if __name__ == "__main__":
    key = jax.random.PRNGKey(0)

    # Small shapes consistent with the module: head_dim=32, max_pos=64, seq=8.
    dim, max_pos, seq_len = 32, 64, 8
    batch, heads = 2, 4

    # x is only used for its dtype in forward (as in the PyTorch module).
    x = jax.random.normal(key, (batch, heads, seq_len, dim), dtype=jnp.float32)

    rope = InternLM2RotaryEmbedding(dim, max_position_embeddings=max_pos, base=10000)
    cos, sin = rope(x, seq_len=seq_len)
    cos = jax.block_until_ready(cos)
    sin = jax.block_until_ready(sin)

    # Reference: plain-JAX computation of the PyTorch semantics.
    t = jnp.arange(max_pos, dtype=jnp.float32)
    inv_freq = 1.0 / (10000 ** (jnp.arange(0, dim, 2, dtype=jnp.float32) / dim))
    freqs = jnp.einsum("i,j->ij", t, inv_freq)
    emb = jnp.concatenate([freqs, freqs], axis=-1)
    cos_ref_full = jnp.cos(emb)
    sin_ref_full = jnp.sin(emb)

    assert cos.shape == (seq_len, dim) and sin.shape == (seq_len, dim)
    assert cos.dtype == x.dtype and sin.dtype == x.dtype
    assert jnp.allclose(cos, cos_ref_full[:seq_len], atol=1e-5), "cos mismatch (flat path)"
    assert jnp.allclose(sin, sin_ref_full[:seq_len], atol=1e-5), "sin mismatch (flat path)"

    # Repeated call with the same seq_len returns the memoized buffers (no new copy).
    cos_again, sin_again = rope(x, seq_len=seq_len)
    assert cos_again is cos and sin_again is sin

    # bf16 consumer dtype: cache emitted directly in bf16 inside the kernel.
    x_bf16 = x.astype(jnp.bfloat16)
    cos_b, sin_b = rope(x_bf16, seq_len=seq_len)
    cos_b = jax.block_until_ready(cos_b)
    assert cos_b.dtype == jnp.bfloat16 and sin_b.dtype == jnp.bfloat16
    assert jnp.allclose(cos_b.astype(jnp.float32), cos_ref_full[:seq_len], atol=1e-2)
    assert jnp.allclose(sin_b.astype(jnp.float32), sin_ref_full[:seq_len], atol=1e-2)

    # seq_len=None -> full cached length; also validates every position/lane of
    # the unique-half -> duplicated-lane MXU expansion.
    cos_n, sin_n = rope(x)
    cos_n = jax.block_until_ready(cos_n)
    assert cos_n.shape == (max_pos, dim)
    assert jnp.allclose(cos_n, cos_ref_full, atol=1e-4), "cos mismatch (full cache)"
    assert jnp.allclose(sin_n, sin_ref_full, atol=1e-4), "sin mismatch (full cache)"

    # Exercise the rows-layout fallback path (dim does not divide 256).
    dim2, max_pos2, seq2 = 512, 32, 8
    x2 = jax.random.normal(key, (1, 2, seq2, dim2), dtype=jnp.float32)
    rope2 = InternLM2RotaryEmbedding(dim2, max_position_embeddings=max_pos2)
    cos2, sin2 = rope2(x2, seq_len=seq2)
    cos2 = jax.block_until_ready(cos2)
    t2 = jnp.arange(max_pos2, dtype=jnp.float32)
    inv_freq2 = 1.0 / (10000 ** (jnp.arange(0, dim2, 2, dtype=jnp.float32) / dim2))
    emb2 = jnp.concatenate([jnp.einsum("i,j->ij", t2, inv_freq2)] * 2, axis=-1)
    assert jnp.allclose(cos2, jnp.cos(emb2)[:seq2], atol=1e-5), "cos mismatch (rows path)"
    assert jnp.allclose(sin2, jnp.sin(emb2)[:seq2], atol=1e-5), "sin mismatch (rows path)"

    print("KERNEL_OK")
</pallas_src>

<mosaic_0001>
module attributes {stable_mosaic.version = 11 : i64} {
  func.func @_rope_flat_kernel(%arg0: i32, %arg1: memref<1x128xi32, #tpu.memory_space<vmem>>, %arg2: memref<1x128xf32, #tpu.memory_space<vmem>>, %arg3: memref<128x256xf32, #tpu.memory_space<vmem>>, %arg4: memref<8x256xf32, #tpu.memory_space<vmem>>, %arg5: memref<8x256xf32, #tpu.memory_space<vmem>>) attributes {dimension_semantics = [#tpu.dimension_semantics<parallel>], iteration_bounds = array<i64: 1>, scalar_prefetch = 0 : i64, scratch_operands = 0 : i64, tpu.core_type = #tpu.core_type<tc>, window_params = [{pipeline_mode = #tpu.pipeline_mode<synchronous>, transform_indices = @transform_0, window_bounds = array<i64: 1, 128>}, {pipeline_mode = #tpu.pipeline_mode<synchronous>, transform_indices = @transform_1, window_bounds = array<i64: 1, 128>}, {pipeline_mode = #tpu.pipeline_mode<synchronous>, transform_indices = @transform_2, window_bounds = array<i64: 128, 256>}, {transform_indices = @transform_3, window_bounds = array<i64: 8, 256>}, {transform_indices = @transform_4, window_bounds = array<i64: 8, 256>}]} {
    %0 = tpu.iota {dimensions = array<i32: 0>} : vector<8x128xi32>
    %c8_i32 = arith.constant 8 : i32
    %1 = arith.muli %arg0, %c8_i32 : i32
    %2 = vector.broadcast %1 : i32 to vector<8x128xi32>
    %3 = arith.addi %0, %2 : vector<8x128xi32>
    %c8_i32_0 = arith.constant 8 : i32
    %4 = vector.broadcast %c8_i32_0 : i32 to vector<8x128xi32>
    %5 = arith.muli %3, %4 : vector<8x128xi32>
    %c0 = arith.constant 0 : index
    %c0_1 = arith.constant 0 : index
    %6 = vector.load %arg1[%c0, %c0_1] : memref<1x128xi32, #tpu.memory_space<vmem>>, vector<1x128xi32>
    %7 = vector.broadcast %6 : vector<1x128xi32> to vector<8x128xi32>
    %8 = arith.addi %5, %7 : vector<8x128xi32>
    %9 = arith.sitofp %8 : vector<8x128xi32> to vector<8x128xf32>
    %c0_2 = arith.constant 0 : index
    %c0_3 = arith.constant 0 : index
    %10 = vector.load %arg2[%c0_2, %c0_3] : memref<1x128xf32, #tpu.memory_space<vmem>>, vector<1x128xf32>
    %11 = vector.broadcast %10 : vector<1x128xf32> to vector<8x128xf32>
    %12 = arith.mulf %9, %11 : vector<8x128xf32>
    %13 = math.cos %12 : vector<8x128xf32>
    %14 = math.sin %12 : vector<8x128xf32>
    %c0_4 = arith.constant 0 : index
    %c0_5 = arith.constant 0 : index
    %15 = vector.load %arg3[%c0_4, %c0_5] : memref<128x256xf32, #tpu.memory_space<vmem>>, vector<128x256xf32>
    %cst = arith.constant dense<0.000000e+00> : vector<8x256xf32>
    %16 = tpu.matmul %13, %15, %cst {dimension_numbers = #tpu.dot_dimension_numbers<[1], [0], [0], [1], [0, 0, 1, 1], [], []>, precision = #tpu.contract_precision<fp32>} : vector<8x128xf32>, vector<128x256xf32>, vector<8x256xf32> -> vector<8x256xf32>
    %c0_6 = arith.constant 0 : index
    %c0_7 = arith.constant 0 : index
    %17 = vector.load %arg4[%c0_6, %c0_7] : memref<8x256xf32, #tpu.memory_space<vmem>>, vector<8x256xf32>
    tpu.vector_store %arg4[%c0_6, %c0_7], %16 {strides = array<i32>} : memref<8x256xf32, #tpu.memory_space<vmem>>, vector<8x256xf32>,
    %cst_8 = arith.constant dense<0.000000e+00> : vector<8x256xf32>
    %18 = tpu.matmul %14, %15, %cst_8 {dimension_numbers = #tpu.dot_dimension_numbers<[1], [0], [0], [1], [0, 0, 1, 1], [], []>, precision = #tpu.contract_precision<fp32>} : vector<8x128xf32>, vector<128x256xf32>, vector<8x256xf32> -> vector<8x256xf32>
    %c0_9 = arith.constant 0 : index
    %c0_10 = arith.constant 0 : index
    %19 = vector.load %arg5[%c0_9, %c0_10] : memref<8x256xf32, #tpu.memory_space<vmem>>, vector<8x256xf32>
    tpu.vector_store %arg5[%c0_9, %c0_10], %18 {strides = array<i32>} : memref<8x256xf32, #tpu.memory_space<vmem>>, vector<8x256xf32>,
    return
  }
  func.func @transform_0(%arg0: i32) -> (i32, i32) {
    %c0_i32 = arith.constant 0 : i32
    %c0_i32_0 = arith.constant 0 : i32
    %c0_i32_1 = arith.constant 0 : i32
    return %c0_i32, %c0_i32_0 : i32, i32
  }
  func.func @transform_1(%arg0: i32) -> (i32, i32) {
    %c0_i32 = arith.constant 0 : i32
    %c0_i32_0 = arith.constant 0 : i32
    %c0_i32_1 = arith.constant 0 : i32
    return %c0_i32, %c0_i32_0 : i32, i32
  }
  func.func @transform_2(%arg0: i32) -> (i32, i32) {
    %c0_i32 = arith.constant 0 : i32
    %c0_i32_0 = arith.constant 0 : i32
    %c0_i32_1 = arith.constant 0 : i32
    return %c0_i32, %c0_i32_0 : i32, i32
  }
  func.func @transform_3(%arg0: i32) -> (i32, i32) {
    %c0_i32 = arith.constant 0 : i32
    %c0_i32_0 = arith.constant 0 : i32
    return %arg0, %c0_i32 : i32, i32
  }
  func.func @transform_4(%arg0: i32) -> (i32, i32) {
    %c0_i32 = arith.constant 0 : i32
    %c0_i32_0 = arith.constant 0 : i32
    return %arg0, %c0_i32 : i32, i32
  }
}

</mosaic_0001>

<bundles_post_ra>
// kernel: _build_cache_flat.1
= control target key start
LH: loop header
LB: loop body
LE: loop exit
PB: predicated region body
PF: predicated region fallthrough
CT: control target
= control target key end

     0   :  { %v3526_v3 = vmov 0.0   ;;  %v16_v53 = vlaneseq  ;;  %s3521_s2 = inlined_call_operand.vmem [shape: f32[128,256], index: 2, kind: input, shape index: {}]   ;;  %s3522_s0 = inlined_call_operand.vmem [shape: s32[1,128], index: 0, kind: input, shape index: {}]   ;;  %s3523_s1 = inlined_call_operand.vmem [shape: f32[1,128], index: 1, kind: input, shape index: {}]   ;;  %s3524_s3 = inlined_call_operand.vmem [shape: f32[8,256], index: 3, kind: output, shape index: {0}]   ;;  %s3525_s4 = inlined_call_operand.vmem [shape: f32[8,256], index: 4, kind: output, shape index: {1}]  }
   0x1   :  { %v2462_v0 = vld [vmem:[%s3521_s2 + $0x8] sm:$0xff]  ;;  %v2467_v1 = vld [vmem:[%s3521_s2 + $0x18] sm:$0xff]  ;;  %v2472_v2 = vld [vmem:[%s3521_s2] sm:$0xff]  ;;  %372 = vmatprep.mubr.f32.mxu0 %v3526_v3  ;;  %1229 = vmatprep.mubr.f32.mxu1 %v3526_v3 }
   0x2   :  { %v276_v4 = vand.u32 4294901760, %v2462_v0  ;;  %v280_v5 = vand.u32 4294901760, %v2467_v1  ;;  %v2481_v6 = vld [vmem:[%s3521_s2 + $0x10] sm:$0xff]  ;;  %v278_v7 = vand.u32 4294901760, %v2472_v2  ;;  %v2487_v8 = vld [vmem:[%s3521_s2 + $0x28] sm:$0xff]  ;;  %v2492_v9 = vld [vmem:[%s3521_s2 + $0x38] sm:$0xff] }
   0x3   :  { %v282_v10 = vand.u32 4294901760, %v2481_v6  ;;  %v284_v11 = vand.u32 4294901760, %v2487_v8  ;;  %v3540_v12 = vand.u32 4294901760, %v2492_v9  ;;  %v2500_v13 = vld [vmem:[%s3521_s2 + $0x20] sm:$0xff]  ;;  %v2505_v14 = vld [vmem:[%s3521_s2 + $0x30] sm:$0xff]  ;;  %v2510_v15 = vld [vmem:[%s3521_s2 + $0x48] sm:$0xff] }
   0x4   :  { %v2516_v16 = vpack.c.bf16 %v280_v5, %v276_v4  ;;  %v3535_v17 = vand.u32 4294901760, %v2500_v13  ;;  %v3534_v18 = vand.u32 4294901760, %v2505_v14  ;;  %v2523_v19 = vld [vmem:[%s3521_s2 + $0x58] sm:$0xff]  ;;  %v3533_v20 = vand.u32 4294901760, %v2510_v15  ;;  %v2529_v21 = vld [vmem:[%s3521_s2 + $0x40] sm:$0xff]  ;;  %v2534_v22 = vld [vmem:[%s3521_s2 + $0x50] sm:$0xff] }
   0x5   :  { %v2540_v23 = vpack.c.bf16 %v282_v10, %v278_v7  ;;  %v2546_v24 = vpack.c.bf16 %v3540_v12, %v284_v11  ;;  %v3532_v25 = vand.u32 4294901760, %v2523_v19  ;;  %v3531_v26 = vand.u32 4294901760, %v2529_v21  ;;  %v2553_v27 = vld [vmem:[%s3521_s2 + $0x68] sm:$0xff]  ;;  %v2558_v28 = vld [vmem:[%s3521_s2 + $0x78] sm:$0xff]  ;;  %v2563_v29 = vld [vmem:[%s3521_s2 + $0x60] sm:$0xff] }
   0x6   :  { %3633 = vst [vmem:[#allocation2_spill] sm:$0xff] %v2516_v16  ;;  %2009 = vmatprep.subr.bf16.mxu0 %v2516_v16  ;;  %2201 = vmatprep.subr.bf16.mxu1 %v2516_v16  ;;  %v3530_v30 = vand.u32 4294901760, %v2534_v22  ;;  %v3529_v31 = vand.u32 4294901760, %v2553_v27  ;;  %v3528_v32 = vand.u32 4294901760, %v2558_v28  ;;  %v2573_v33 = vld [vmem:[%s3521_s2 + $0x70] sm:$0xff]  ;;  %v2578_v34 = vld [vmem:[%s3521_s2 + $0x88] sm:$0xff]  ;;  %v2591_v36 = vpack.c.bf16 %v3534_v18, %v3535_v17 }
   0x7   :  { %3634 = vst [vmem:[#allocation3_spill] sm:$0xff] %v2540_v23  ;;  %3635 = vst [vmem:[#allocation4_spill] sm:$0xff] %v2546_v24  ;;  %v2583_v35 = vld [vmem:[%s3521_s2 + $0x98] sm:$0xff]  ;;  %2011 = vmatpush1.bf16.msra.mxu0 %v2540_v23  ;;  %2203 = vmatpush1.bf16.msra.mxu1 %v2540_v23  ;;  %v3537_v37 = vand.u32 4294901760, %v2563_v29  ;;  %v2597_v38 = vld [vmem:[%s3521_s2 + $0x80] sm:$0xff]  ;;  %v2615_v41 = vpack.c.bf16 %v3532_v25, %v3533_v20  ;;  %v3536_v42 = vand.u32 4294901760, %v2573_v33 }
   0x8   :  { %3636 = vst [vmem:[#allocation5_spill] sm:$0xff] %v2591_v36  ;;  %v2602_v39 = vld [vmem:[%s3521_s2 + $0x90] sm:$0xff]  ;;  %v2607_v40 = vld [vmem:[%s3521_s2 + $0xa8] sm:$0xff]  ;;  %2013 = vmatprep.subr.bf16.mxu0 %v2546_v24  ;;  %2205 = vmatprep.subr.bf16.mxu1 %v2546_v24  ;;  %v3539_v43 = vand.u32 4294901760, %v2578_v34  ;;  %v3538_v44 = vand.u32 4294901760, %v2583_v35  ;;  %v2623_v45 = vld [vmem:[%s3521_s2 + $0xb8] sm:$0xff]  ;;  %v2656_v54 = vpack.c.bf16 %v3530_v30, %v3531_v26  ;;  %v2662_v55 = vpack.c.bf16 %v3528_v32, %v3529_v31 }
   0x9   :  { %3637 = vst [vmem:[#allocation6_spill] sm:$0xff] %v2615_v41  ;;  %v2628_v46 = vld [vmem:[%s3521_s2 + $0xa0] sm:$0xff]  ;;  %v2633_v47 = vld [vmem:[%s3521_s2 + $0xb0] sm:$0xff]  ;;  %v3557_v48 = vand.u32 4294901760, %v2597_v38  ;;  %v3541_v49 = vand.u32 4294901760, %v2602_v39  ;;  %v2640_v50 = vld [vmem:[%s3521_s2 + $0xc8] sm:$0xff]  ;;  %v2703_v30 = vpack.c.bf16 %v3536_v42, %v3537_v37  ;;  %v2724_v37 = vsub.f32 %v2462_v0, %v276_v4 }
   0xa   :  { %v2645_v51 = vld [vmem:[%s3521_s2 + $0xd8] sm:$0xff]  ;;  %v2650_v52 = vld [vmem:[%s3521_s2 + $0xc0] sm:$0xff]  ;;  %3638 = vst [vmem:[#allocation7_spill] sm:$0xff] %v2656_v54  ;;  %3639 = vst [vmem:[#allocation8_spill] sm:$0xff] %v2662_v55  ;;  %v3547_v56 = vand.u32 4294901760, %v2607_v40  ;;  %v3546_v57 = vand.u32 4294901760, %v2623_v45  ;;  %v2709_v26 = vpack.c.bf16 %v3538_v44, %v3539_v43  ;;  %v2731_v12 = vsub.f32 %v2467_v1, %v280_v5 }
   0xb   :  { %v2669_v58 = vld [vmem:[%s3521_s2 + $0xd0] sm:$0xff]  ;;  %v2674_v59 = vld [vmem:[%s3521_s2 + $0xe8] sm:$0xff]  ;;  %v2679_v60 = vld [vmem:[%s3521_s2 + $0xf8] sm:$0xff]  ;;  %2015 = vmatpush1.bf16.msra.mxu0 %v2591_v36  ;;  %2207 = vmatpush1.bf16.msra.mxu1 %v2591_v36  ;;  %v3543_v61 = vand.u32 4294901760, %v2628_v46  ;;  %v3542_v62 = vand.u32 4294901760, %v2633_v47  ;;  %v3545_v63 = vand.u32 4294901760, %v2640_v50  ;;  %v2717_v18 = vpack.c.bf16 %v3541_v49, %v3557_v48 }
   0xc   :  { %v3544_v3 = vand.u32 4294901760, %v2645_v51  ;;  %v2690_v32 = vld [vmem:[%s3521_s2 + $0xe0] sm:$0xff]  ;;  %v2695_v31 = vld [vmem:[%s3521_s2 + $0xf0] sm:$0xff]  ;;  %2017 = vmatprep.subr.bf16.mxu0 %v2615_v41  ;;  %2209 = vmatprep.subr.bf16.mxu1 %v2615_v41  ;;  %3640 = vst [vmem:[#allocation9_spill] sm:$0xff] %v2703_v30  ;;  %3641 = vst [vmem:[#allocation10_spill] sm:$0xff] %v2709_v26  ;;  %v3554_v25 = vand.u32 4294901760, %v2650_v52  ;;  %v2739_v0 = vpack.c.bf16 %v3546_v57, %v3547_v56 }
   0xd   :  { %v3548_v20 = vand.u32 4294901760, %v2669_v58  ;;  %3642 = vst [vmem:[#allocation11_spill] sm:$0xff] %v2717_v18  ;;  %v3550_v17 = vand.u32 4294901760, %v2674_v59  ;;  %v3549_v42 = vand.u32 4294901760, %v2679_v60  ;;  %v3553_v44 = vand.u32 4294901760, %v2690_v32 }
   0xe   :  { %v3552_v43 = vand.u32 4294901760, %v2695_v31  ;;  %v17_v49 = vshrl.u32 %v16_v53, 7  ;;  %3643 = vst [vmem:[#allocation12_spill] sm:$0xff] %v2739_v0  ;;  %v2745_v4 = vpack.c.bf16 %v3542_v62, %v3543_v61  ;;  %v2751_v1 = vpack.c.bf16 %v3544_v3, %v3545_v63  ;;  %v1998_v53 = vld [vmem:[%s3522_s0] ss:$0 sm:$0xff] }
   0xf   :  { %2019 = vmatpush1.bf16.msra.mxu0 %v2656_v54  ;;  %2211 = vmatpush1.bf16.msra.mxu1 %v2656_v54  ;;  %v3551_v5 = vand.u32 4294901760, %v2724_v37  ;;  %v2763_v62 = vpack.c.bf16 %v3548_v20, %v3554_v25  ;;  %v3555_v61 = vand.u32 4294901760, %v2731_v12  ;;  %v2769_v63 = vsub.f32 %v2472_v2, %v278_v7 }
  0x10   :  { %3644 = vst [vmem:[#allocation13_spill] sm:$0xff] %v2745_v4  ;;  %3645 = vst [vmem:[#allocation14_spill] sm:$0xff] %v2751_v1  ;;  %2021 = vmatprep.subr.bf16.mxu0 %v2662_v55  ;;  %2213 = vmatprep.subr.bf16.mxu1 %v2662_v55  ;;  %v21_v3 = vmul.u32 8, %v17_v49  ;;  %v2775_v57 = vpack.c.bf16 %v3549_v42, %v3550_v17  ;;  %v2780_v56 = vsub.f32 %v2481_v6, %v282_v10  ;;  %v2433_v41 = vmov 1326507024  }
  0x11   :  { %3646 = vst [vmem:[#allocation15_spill] sm:$0xff] %v2763_v62  ;;  %v2785_v49 = vsub.f32 %v2487_v8, %v284_v11  ;;  %v3648_v20 = vand.u32 4294901760, %v2492_v9  ;;  %v2796_v7 = vpack.c.bf16 %v3552_v43, %v3553_v44  ;;  %v3556_v6 = vand.u32 4294901760, %v2769_v63 }
  0x12   :  { %3647 = vst [vmem:[#allocation16_spill] sm:$0xff] %v2775_v57  ;;  %v27_v42 = vadd.s32 %v1998_v53, %v21_v3  ;;  %v3650_v10 = vand.u32 4294901760, %v2500_v13  ;;  %v387_v8 = vsub.f32 %v2724_v37, %v3551_v5  ;;  %v3558_v3 = vand.u32 4294901760, %v2780_v56 }
  0x13   :  { %v2790_v2 = vsub.f32 %v2492_v9, %v3648_v20  ;;  %3649 = vst [vmem:[#allocation17_spill] sm:$0xff] %v2796_v7  ;;  %2023 = vmatpush1.bf16.msra.mxu0 %v2703_v30  ;;  %2215 = vmatpush1.bf16.msra.mxu1 %v2703_v30  ;;  %v1999_v9 = vld [vmem:[%s3523_s1] ss:$0 sm:$0xff]  ;;  %v3559_v11 = vand.u32 4294901760, %v2785_v49 }
  0x14   :  { %v2802_v17 = vsub.f32 %v2500_v13, %v3650_v10  ;;  %2025 = vmatprep.subr.bf16.mxu0 %v2709_v26  ;;  %2217 = vmatprep.subr.bf16.mxu1 %v2709_v26  ;;  %v399_v13 = vsub.f32 %v2731_v12, %v3555_v61  ;;  %v28_v53 = vcvt.s32.f32 %v27_v42  ;;  %v393_v10 = vsub.f32 %v2769_v63, %v3556_v6 }
  0x15   :  { %v3564_v20 = vand.u32 4294901760, %v2790_v2  ;;  %v405_v43 = vsub.f32 %v2780_v56, %v3558_v3  ;;  %v411_v44 = vsub.f32 %v2785_v49, %v3559_v11  ;;  %v3651_v42 = vand.u32 4294901760, %v2505_v14 }
  0x16   :  { %v3565_v5 = vand.u32 4294901760, %v2802_v17  ;;  %v2838_v6 = vmul.f32 %v1999_v9, %v28_v53  ;;  %v394_v48 = vand.u32 4294901760, %v393_v10  ;;  %v400_v9 = vand.u32 4294901760, %v399_v13 }
  0x17   :  { %v423_v25 = vsub.f32 %v2790_v2, %v3564_v20  ;;  %v2836_v61 = vsub.f32 %v2505_v14, %v3651_v42  ;;  %2027 = vmatpush1.bf16.msra.mxu0 %v2717_v18  ;;  %2219 = vmatpush1.bf16.msra.mxu1 %v2717_v18  ;;  %v406_v11 = vand.u32 4294901760, %v405_v43  ;;  %v412_v26 = vand.u32 4294901760, %v411_v44 }
  0x18   :  { %v417_v3 = vsub.f32 %v2802_v17, %v3565_v5  ;;  %2029 = vmatprep.subr.bf16.mxu0 %v2739_v0  ;;  %2221 = vmatprep.subr.bf16.mxu1 %v2739_v0  ;;  %v388_v14 = vand.u32 4294901760, %v387_v8  ;;  %v3569_v53 = vand.u32 2147483647, %v2838_v6  ;;  %v40_v10 = vand.u32 2139095040, %v2838_v6 }
  0x19   :  { %v424_v30 = vand.u32 4294901760, %v423_v25  ;;  %v3568_v20 = vand.u32 4294901760, %v2836_v61  ;;  %v2850_v42 = vpack.c.bf16 %v406_v11, %v394_v48  ;;  %v3652_v8 = vand.u32 4294901760, %v2510_v15 }
  0x1a   :  { %v418_v18 = vand.u32 4294901760, %v417_v3  ;;  %v41_v43 = vshrl.u32 %v40_v10, 23  ;;  %v44_v44 = vand.u32 8388607, %v3569_v53  ;;  %v3654_v3 = vand.u32 4294901760, %v2529_v21 }
  0x1b   :  { %v2852_v5 = vpack.c.bf16 %v424_v30, %v412_v26  ;;  %v429_v25 = vsub.f32 %v2836_v61, %v3568_v20  ;;  %v2862_v13 = vsub.f32 %v2510_v15, %v3652_v8  ;;  %2031 = vmatpush1.bf16.msra.mxu0 %v2745_v4  ;;  %2223 = vmatpush1.bf16.msra.mxu1 %v2745_v4  ;;  %v3653_v30 = vand.u32 4294901760, %v2523_v19 }
  0x1c   :  { %v2874_v11 = vsub.f32 %v2529_v21, %v3654_v3  ;;  %v3655_v10 = vand.u32 4294901760, %v2534_v22  ;;  %2033 = vmatprep.subr.bf16.mxu0 %v2751_v1  ;;  %2225 = vmatprep.subr.bf16.mxu1 %v2751_v1  ;;  %v2000_v8 = vadd.s32 4294967169, %v41_v43  ;;  %v45_v53 = vor.u32 8388608, %v44_v44 }
  0x1d   :  { %v430_v26 = vand.u32 4294901760, %v429_v25  ;;  %v2869_v48 = vsub.f32 %v2523_v19, %v3653_v30  ;;  %v2040_v25 = vpack.c.bf16 %v400_v9, %v388_v14  ;;  %v3574_v20 = vand.u32 4294901760, %v2862_v13 }
  0x1e   :  { %v2879_v15 = vsub.f32 %v2534_v22, %v3655_v10  ;;  %v3656_v19 = vand.u32 4294901760, %v2553_v27  ;;  %v3572_v22 = vand.u32 4294901760, %v2874_v11  ;;  %v47_v4 = vadd.s32 1, %v2000_v8 }
  0x1f   :  { %v2889_v21 = vpack.c.bf16 %v430_v26, %v418_v18  ;;  %v3573_v3 = vand.u32 4294901760, %v2869_v48  ;;  %v435_v14 = vsub.f32 %v2862_v13, %v3574_v20  ;;  %2035 = vmatpush1.bf16.msra.mxu0 %v2763_v62  ;;  %2227 = vmatpush1.bf16.msra.mxu1 %v2763_v62  ;;  %v3658_v8 = vand.u32 4294901760, %v2558_v28 }
  0x20   :  { %v2887_v30 = vsub.f32 %v2553_v27, %v3656_v19  ;;  %v3575_v10 = vand.u32 4294901760, %v2879_v15  ;;  %v441_v27 = vsub.f32 %v2874_v11, %v3572_v22  ;;  %2037 = vmatprep.subr.bf16.mxu0 %v2775_v57  ;;  %2229 = vmatprep.subr.bf16.mxu1 %v2775_v57  ;;  %vm48_vm0 = vcmp.gt.s32.totalorder %v47_v4, 0 }
  0x21   :  { %3657 = vst [vmem:[#allocation18_spill] sm:$0xff] %v2889_v21  ;;  %v447_v18 = vsub.f32 %v2869_v48, %v3573_v3  ;;  %v436_v44 = vand.u32 4294901760, %v435_v14  ;;  %v2919_v19 = vsub.f32 %v2558_v28, %v3658_v8  ;;  %v49_v22 = vsel %vm48_vm0, %v47_v4, 0 }
  0x22   :  { %v3582_v9 = vand.u32 4294901760, %v2887_v30  ;;  %v453_v43 = vsub.f32 %v2879_v15, %v3575_v10  ;;  %v442_v20 = vand.u32 4294901760, %v441_v27  ;;  %v50_v62 = vshrl.u32 %v49_v22, 5 }
  0x23   :  { %v448_v3 = vand.u32 4294901760, %v447_v18  ;;  %v51_v1 = vand.u32 31, %v49_v22  ;;  %v2921_v0 = vshll.u32 %v45_v53, 8  ;;  %2039 = vmatpush1.bf16.msra.mxu0 %v2796_v7  ;;  %2231 = vmatpush1.bf16.msra.mxu1 %v2796_v7  ;;  %v3661_v4 = vand.u32 4294901760, %v2563_v29 }
  0x24   :  { %v2914_v26 = vsub.f32 %v2887_v30, %v3582_v9  ;;  %v454_v10 = vand.u32 4294901760, %v453_v43  ;;  %2041 = vmatprep.subr.bf16.mxu0 %v2040_v25  ;;  %2233 = vmatprep.subr.bf16.mxu1 %v2040_v25  ;;  %v2428_v22 = vmov 683565275   ;;  %v2429_v43 = vmov 2475754826  }
  0x25   :  { %v2926_v9 = vpack.c.bf16 %v448_v3, %v436_v44  ;;  %v2934_v18 = vsub.f32 %v2563_v29, %v3661_v4  ;;  %v52_v53 = vsub.s32 32, %v51_v1  ;;  %v54_v27 = vshll.u32 %v2428_v22, %v51_v1 }
  0x26   :  { %v460_v14 = vand.u32 4294901760, %v2914_v26  ;;  %v2928_v57 = vpack.c.bf16 %v454_v10, %v442_v20  ;;  %v57_v26 = vshll.u32 %v2429_v43, %v51_v1  ;;  %v2430_v8 = vmov 2131351028  }
  0x27   :  { %3659 = vst [vmem:[#allocation19_spill] sm:$0xff] %v2926_v9  ;;  %v60_v7 = vshll.u32 %v2430_v8, %v51_v1  ;;  %v2431_v3 = vmov 2102212464   ;;  %v2432_v20 = vmov 920167782   ;;  %vm69_vm1 = vcmp.lt.s32.totalorder %v50_v62, 1 }
  0x28   :  { %3660 = vst [vmem:[#allocation20_spill] sm:$0xff] %v2928_v57  ;;  %v63_v44 = vshll.u32 %v2431_v3, %v51_v1  ;;  %v66_v10 = vshll.u32 %v2432_v20, %v51_v1  ;;  %vm70_vm2 = vcmp.lt.s32.totalorder %v50_v62, 2  ;;  %v53_v28 = vshrl.u32 %v2428_v22, %v52_v53 }
  0x29   :  { %v55_v55 = vshrl.u32 %v2429_v43, %v52_v53  ;;  %v58_v54 = vshrl.u32 %v2430_v8, %v52_v53  ;;  %v61_v29 = vshrl.u32 %v2431_v3, %v52_v53  ;;  %v64_v4 = vshrl.u32 %v2432_v20, %v52_v53 }
  0x2a   :  { %v67_v25 = vshrl.u32 %v2433_v41, %v52_v53  ;;  %vm71_vm3 = vcmp.lt.s32.totalorder %v50_v62, 3  ;;  %vm72_vm4 = vcmp.lt.s32.totalorder %v50_v62, 4  ;;  %v3662_v16 = vand.u32 4294901760, %v2919_v19 }
  0x2b   :  { %v56_v36 = vor.u32 %v55_v55, %v54_v27  ;;  %v59_v24 = vor.u32 %v58_v54, %v57_v26  ;;  %v62_v23 = vor.u32 %v61_v29, %v60_v7  ;;  %v65_v9 = vor.u32 %v64_v4, %v63_v44 }
  0x2c   :  { %v471_v57 = vsub.f32 %v2919_v19, %v3662_v16  ;;  %v68_v1 = vor.u32 %v67_v25, %v66_v10  ;;  %v3620_v21 = vand.u32 4294901760, %v2934_v18  ;;  %v3663_v22 = vand.u32 4294901760, %v2573_v33 }
  0x2d   :  { %v73_v41 = vsel %vm69_vm1, %v53_v28, %v56_v36  ;;  %v74_v53 = vsel %vm72_vm4, %v62_v23, 2102212464  ;;  %v77_v55 = vsel %vm69_vm1, %v56_v36, %v59_v24  ;;  %v81_v54 = vsel %vm69_vm1, %v59_v24, %v62_v23 }
  0x2e   :  { %v2943_v43 = vsub.f32 %v2573_v33, %v3663_v22  ;;  %v75_v7 = vsel %vm71_vm3, %v59_v24, %v74_v53  ;;  %v78_v27 = vsel %vm72_vm4, %v65_v9, 920167782  ;;  %v82_v16 = vsel %vm72_vm4, %v68_v1, 1326507024 }
  0x2f   :  { %v472_v26 = vand.u32 4294901760, %v471_v57  ;;  %v76_v8 = vsel %vm70_vm2, %v73_v41, %v75_v7  ;;  %v79_v3 = vsel %vm71_vm3, %v62_v23, %v78_v27  ;;  %v83_v44 = vsel %vm71_vm3, %v65_v9, %v82_v16 }
  0x30   :  { %v465_v33 = vsub.f32 %v2934_v18, %v3620_v21  ;;  %v80_v28 = vsel %vm70_vm2, %v77_v55, %v79_v3  ;;  %v84_v36 = vsel %vm70_vm2, %v81_v54, %v83_v44  ;;  %v92_v20 = vmul.u32 %v2921_v0, %v76_v8 }
  0x31   :  { %v2958_v24 = vpack.c.bf16 %v472_v26, %v460_v14  ;;  %v2961_v57 = vmul.u32.u64.low %v2921_v0, %v84_v36  ;;  %v2962_v10 = vmul.u32.u64.high %v2921_v0, %v84_v36, %v2961_v57  ;;  %v3619_v4 = vand.u32 4294901760, %v2943_v43 }
  0x32   :  { %v2965_v23 = vmul.u32.u64.low %v2921_v0, %v80_v28  ;;  %v2966_v29 = vmul.u32.u64.high %v2921_v0, %v80_v28, %v2965_v23  ;;  %v466_v9 = vand.u32 4294901760, %v465_v33  ;;  %v3664_v25 = vand.u32 4294901760, %v2578_v34 }
  0x33   :  { %v3665_v14 = vand.u32 4294901760, %v2583_v35  ;;  %v3666_v22 = vand.u32 4294901760, %v2597_v38  ;;  %v3667_v0 = vand.u32 4294901760, %v2602_v39  ;;  %v3668_v55 = vand.u32 4294901760, %v2607_v40 }
  0x34   :  { %v2973_v62 = vsub.f32 %v2578_v34, %v3664_v25  ;;  %v3669_v54 = vand.u32 4294901760, %v2623_v45  ;;  %vm94_vm5 = vc.u32 %v2962_v10, %v2965_v23  ;;  %vm39_vm7 = vcmp.lt.s32.totalorder %v2838_v6, 0 }
  0x35   :  { %v2978_v1 = vsub.f32 %v2583_v35, %v3665_v14  ;;  %v2983_v41 = vsub.f32 %v2597_v38, %v3666_v22  ;;  %v2988_v53 = vsub.f32 %v2602_v39, %v3667_v0  ;;  %v2993_v34 = vsub.f32 %v2607_v40, %v3668_v55 }
  0x36   :  { %v2998_v35 = vsub.f32 %v2623_v45, %v3669_v54  ;;  %v477_v38 = vsub.f32 %v2943_v43, %v3619_v4  ;;  %v3618_v7 = vand.u32 4294901760, %v2973_v62  ;;  %v3670_v39 = vand.u32 4294901760, %v2628_v46 }
  0x37   :  { %v3611_v27 = vand.u32 4294901760, %v2978_v1  ;;  %v95_v40 = vadd.s32 1, %v2966_v29  ;;  %v3610_v45 = vand.u32 4294901760, %v2983_v41  ;;  %v3609_v44 = vand.u32 4294901760, %v2988_v53 }
  0x38   :  { %v3008_v16 = vsub.f32 %v2628_v46, %v3670_v39  ;;  %v478_v26 = vand.u32 4294901760, %v477_v38  ;;  %v483_v8 = vsub.f32 %v2973_v62, %v3618_v7  ;;  %v3604_v28 = vand.u32 4294901760, %v2993_v34 }
  0x39   :  { %v495_v3 = vsub.f32 %v2978_v1, %v3611_v27  ;;  %v96_v46 = vsel %vm94_vm5, %v95_v40, %v2966_v29  ;;  %v489_v33 = vsub.f32 %v2983_v41, %v3610_v45  ;;  %v3605_v36 = vand.u32 4294901760, %v2998_v35 }
  0x3a   :  { %v97_v57 = vadd.s32 %v96_v46, %v92_v20  ;;  %v3027_v25 = vpack.c.bf16 %v478_v26, %v466_v9  ;;  %v484_v14 = vand.u32 4294901760, %v483_v8  ;;  %v501_v55 = vsub.f32 %v2988_v53, %v3609_v44 }
  0x3b   :  { %v496_v22 = vand.u32 4294901760, %v495_v3  ;;  %v490_v0 = vand.u32 4294901760, %v489_v33  ;;  %v507_v29 = vsub.f32 %v2993_v34, %v3604_v28  ;;  %v519_v54 = vsub.f32 %v2998_v35, %v3605_v36 }
  0x3c   :  { %v98_v38 = vadd.s32 536870912, %v97_v57  ;;  %v3606_v20 = vand.u32 4294901760, %v3008_v16  ;;  %v3671_v9 = vand.u32 4294901760, %v2633_v47  ;;  %v502_v26 = vand.u32 4294901760, %v501_v55 }
  0x3d   :  { %v3038_v39 = vpack.c.bf16 %v496_v22, %v484_v14  ;;  %v508_v8 = vand.u32 4294901760, %v507_v29  ;;  %v520_v3 = vand.u32 4294901760, %v519_v54  ;;  %v3672_v46 = vand.u32 4294901760, %v2640_v50 }
  0x3e   :  { %v3044_v40 = vsub.f32 %v2633_v47, %v3671_v9  ;;  %v3051_v28 = vshrl.u32 %v98_v38, 30  ;;  %v513_v14 = vsub.f32 %v3008_v16, %v3606_v20  ;;  %v3673_v36 = vand.u32 4294901760, %v2645_v51 }
  0x3f   :  { %v3049_v33 = vsub.f32 %v2640_v50, %v3672_v46  ;;  %v3062_v55 = vpack.c.bf16 %v502_v26, %v490_v0  ;;  %v3064_v29 = vpack.c.bf16 %v520_v3, %v508_v8  ;;  %v3674_v54 = vand.u32 4294901760, %v2650_v52 }
  0x40   :  { %v3607_v22 = vand.u32 4294901760, %v3044_v40  ;;  %v3060_v47 = vsub.f32 %v2645_v51, %v3673_v36  ;;  %v100_v9 = vshll.u32 %v3051_v28, 30  ;;  %v514_v46 = vand.u32 4294901760, %v513_v14 }
  0x41   :  { %v3608_v50 = vand.u32 4294901760, %v3049_v33  ;;  %v3070_v38 = vsub.f32 %v2650_v52, %v3674_v54  ;;  %v3675_v26 = vand.u32 4294901760, %v2669_v58  ;;  %v3676_v14 = vand.u32 4294901760, %v2674_v59 }
  0x42   :  { %v525_v20 = vsub.f32 %v3044_v40, %v3607_v22  ;;  %v3615_v36 = vand.u32 4294901760, %v3060_v47  ;;  %v101_v8 = vsub.s32 %v97_v57, %v100_v9  ;;  %vm129_vm15 = vweird.f32 %v2838_v6 }
  0x43   :  { %v531_v51 = vsub.f32 %v3049_v33, %v3608_v50  ;;  %v3612_v0 = vand.u32 4294901760, %v3070_v38  ;;  %v3084_v52 = vsub.f32 %v2669_v58, %v3675_v26  ;;  %v3089_v54 = vsub.f32 %v2674_v59, %v3676_v14 }
  0x44   :  { %v526_v3 = vand.u32 4294901760, %v525_v20  ;;  %v543_v50 = vsub.f32 %v3060_v47, %v3615_v36  ;;  %v103_v45 = vsub.s32 0, %v101_v8 }
  0x45   :  { %v532_v22 = vand.u32 4294901760, %v531_v51  ;;  %v537_v44 = vsub.f32 %v3070_v38, %v3612_v0  ;;  %v3614_v57 = vand.u32 4294901760, %v3084_v52  ;;  %v3613_v20 = vand.u32 4294901760, %v3089_v54 }
  0x46   :  { %v3097_v27 = vpack.c.bf16 %v526_v3, %v514_v46  ;;  %v544_v58 = vand.u32 4294901760, %v543_v50  ;;  %v2001_v9 = vmin.u32 %v103_v45, %v101_v8  ;;  %v3677_v46 = vand.u32 4294901760, %v2679_v60 }
  0x47   :  { %v538_v51 = vand.u32 4294901760, %v537_v44  ;;  %v549_v26 = vsub.f32 %v3084_v52, %v3614_v57  ;;  %v555_v14 = vsub.f32 %v3089_v54, %v3613_v20  ;;  %v3678_v3 = vand.u32 4294901760, %v2690_v32 }
  0x48   :  { %v3101_v59 = vpack.c.bf16 %v544_v58, %v532_v22  ;;  %v105_v0 = vclz %v2001_v9  ;;  %v3112_v50 = vsub.f32 %v2679_v60, %v3677_v46  ;;  %v3679_v44 = vand.u32 4294901760, %v2695_v31 }
  0x49   :  { %v3117_v45 = vsub.f32 %v2690_v32, %v3678_v3  ;;  %v93_v58 = vadd.s32 %v2965_v23, %v2962_v10  ;;  %v550_v20 = vand.u32 4294901760, %v549_v26  ;;  %v556_v57 = vand.u32 4294901760, %v555_v14 }
  0x4a   :  { %v3122_v22 = vsub.f32 %v2695_v31, %v3679_v44  ;;  %v2002_v9 = vadd.s32 4294967294, %v105_v0  ;;  %v3616_v36 = vand.u32 4294901760, %v3112_v50  ;;  %v3133_v3 = vpack.c.bf16 %v2731_v12, %v2724_v37 }
  0x4b   :  { %v3617_v60 = vand.u32 4294901760, %v3117_v45  ;;  %v3128_v46 = vpack.c.bf16 %v550_v20, %v538_v51  ;;  %v3137_v31 = vpack.c.bf16 %v2780_v56, %v2769_v63  ;;  %v3147_v0 = vpack.c.bf16 %v2790_v2, %v2785_v49 }
  0x4c   :  { %v3621_v32 = vand.u32 4294901760, %v3122_v22  ;;  %vm2003_vm6 = vcmp.lt.s32.totalorder %v2002_v9, 0  ;;  %v567_v10 = vsub.f32 %v3112_v50, %v3616_v36  ;;  %v3154_v26 = vpack.c.bf16 %v2836_v61, %v2802_v17 }
  0x4d   :  { %3680 = vst [vmem:[#allocation21_spill] sm:$0xff] %v3137_v31  ;;  %v561_v23 = vsub.f32 %v3117_v45, %v3617_v60  ;;  %3681 = vst [vmem:[#allocation22_spill] sm:$0xff] %v3147_v0  ;;  %v108_v20 = vsel %vm2003_vm6, 0, %v2002_v9  ;;  %v3158_v14 = vpack.c.bf16 %v2869_v48, %v2862_v13  ;;  %v3162_v9 = vpack.c.bf16 %v2879_v15, %v2874_v11 }
  0x4e   :  { %v573_v51 = vsub.f32 %v3122_v22, %v3621_v32  ;;  %3682 = vst [vmem:[#allocation23_spill] sm:$0xff] %v3154_v26  ;;  %v109_v44 = vsub.s32 32, %v108_v20  ;;  %v110_v36 = vshll.u32 %v101_v8, %v108_v20  ;;  %v113_v60 = vsub.s32 4294967266, %v108_v20 }
  0x4f   :  { %3683 = vst [vmem:[#allocation24_spill] sm:$0xff] %v3158_v14  ;;  %v568_v7 = vand.u32 4294901760, %v567_v10  ;;  %v562_v4 = vand.u32 4294901760, %v561_v23  ;;  %v3166_v32 = vpack.c.bf16 %v2919_v19, %v2887_v30  ;;  %v3172_v14 = vpack.c.bf16 %v2943_v43, %v2934_v18 }
  0x50   :  { %v574_v21 = vand.u32 4294901760, %v573_v51  ;;  %v111_v0 = vshrl.u32 %v93_v58, %v109_v44  ;;  %v114_v26 = vadd.s32 127, %v113_v60  ;;  %v3178_v10 = vpack.c.bf16 %v2978_v1, %v2973_v62 }
  0x51   :  { %v3168_v31 = vpack.c.bf16 %v568_v7, %v556_v57  ;;  %v3182_v23 = vpack.c.bf16 %v2988_v53, %v2983_v41  ;;  %v3186_v58 = vpack.c.bf16 %v2998_v35, %v2993_v34  ;;  %v3190_v60 = vpack.c.bf16 %v3044_v40, %v3008_v16 }
  0x52   :  { %v3174_v8 = vpack.c.bf16 %v574_v21, %v562_v4  ;;  %3684 = vst [vmem:[#allocation25_spill] sm:$0xff] %v3178_v10  ;;  %v112_v7 = vor.u32 %v111_v0, %v110_v36  ;;  %v115_v57 = vshll.u32 %v114_v26, 23  ;;  %v3194_v21 = vpack.c.bf16 %v3060_v47, %v3049_v33 }
  0x53   :  { %3685 = vst [vmem:[#allocation26_spill] sm:$0xff] %v3182_v23  ;;  %3686 = vst [vmem:[#allocation27_spill] sm:$0xff] %v3186_v58  ;;  %v3198_v4 = vpack.c.bf16 %v3084_v52, %v3070_v38  ;;  %v3202_v20 = vpack.c.bf16 %v3112_v50, %v3089_v54  ;;  %v3206_v36 = vpack.c.bf16 %v3122_v22, %v3117_v45  ;;  %v123_v44 = vsub.s32 4, %v3051_v28 }
  0x54   :  { %3687 = vst [vmem:[#allocation28_spill] sm:$0xff] %v3190_v60  ;;  %3688 = vst [vmem:[#allocation29_spill] sm:$0xff] %v3194_v21  ;;  %v116_v0 = vor.u32 4788187, %v115_v57  ;;  %v119_v51 = vcvt.s32.f32 %v112_v7  ;;  %v3691_v60 = vand.u32 4294901760, %v2724_v37  ;;  %v3692_v21 = vand.u32 4294901760, %v2731_v12 }
  0x55   :  { %3689 = vst [vmem:[#allocation30_spill] sm:$0xff] %v3198_v4  ;;  %3690 = vst [vmem:[#allocation31_spill] sm:$0xff] %v3202_v20  ;;  %v3693_v23 = vand.u32 4294901760, %v2769_v63  ;;  %v3694_v20 = vand.u32 4294901760, %v2780_v56  ;;  %v3695_v7 = vand.u32 2147483647, %v2838_v6 }
  0x56   :  { %v117_v26 = vand.u32 2147483647, %v116_v0  ;;  %v3213_v58 = vpack.c.bf16 %v3692_v21, %v3691_v60  ;;  %v124_v0 = vsel %vm39_vm7, %v123_v44, %v3051_v28  ;;  %v3696_v37 = vand.u32 4294901760, %v2785_v49 }
  0x57   :  { %v3219_v10 = vpack.c.bf16 %v3694_v20, %v3693_v23  ;;  %vm38_vm8 = vcmp.le.f32.partialorder %v3695_v7, 0.7853982  ;;  %v3697_v12 = vand.u32 4294901760, %v2790_v2  ;;  %v3698_v63 = vand.u32 4294901760, %v2802_v17 }
  0x58   :  { %v120_v4 = vmul.f32 %v119_v51, %v117_v26  ;;  %v3699_v56 = vand.u32 4294901760, %v2836_v61  ;;  %v126_v51 = vsel %vm38_vm8, 0, %v124_v0  ;;  %v3700_v26 = vand.u32 4294901760, %v2862_v13 }
  0x59   :  { %v3229_v60 = vpack.c.bf16 %v3697_v12, %v3696_v37  ;;  %v3701_v28 = vand.u32 4294901760, %v2869_v48  ;;  %v3702_v2 = vand.u32 4294901760, %v2874_v11  ;;  %v3703_v17 = vand.u32 4294901760, %v2879_v15 }
  0x5a   :  { %v121_v57 = vxor.u32 2147483648, %v120_v4  ;;  %v3235_v23 = vpack.c.bf16 %v3699_v56, %v3698_v63  ;;  %v233_v61 = vadd.s32 3, %v126_v51  ;;  %v3705_v7 = vand.u32 4294901760, %v2919_v19 }
  0x5b   :  { %v3242_v49 = vpack.c.bf16 %v3701_v28, %v3700_v26  ;;  %v3248_v44 = vpack.c.bf16 %v3703_v17, %v3702_v2  ;;  %v3706_v13 = vand.u32 4294901760, %v2934_v18  ;;  %v3707_v48 = vand.u32 4294901760, %v2943_v43 }
  0x5c   :  { %v122_v21 = vsel %vm39_vm7, %v121_v57, %v120_v4  ;;  %v3704_v4 = vand.u32 4294901760, %v2887_v30  ;;  %v130_v37 = vand.u32 3, %v126_v51  ;;  %v234_v12 = vand.u32 3, %v233_v61 }
  0x5d   :  { %v125_v20 = vsel %vm38_vm8, %v2838_v6, %v122_v21  ;;  %v3260_v0 = vpack.c.bf16 %v3707_v48, %v3706_v13  ;;  %v3708_v11 = vand.u32 4294901760, %v2973_v62  ;;  %v3709_v15 = vand.u32 4294901760, %v2978_v1 }
  0x5e   :  { %2423 = vcosq.f32 %v125_v20  ;;  %v3254_v57 = vpack.c.bf16 %v3705_v7, %v3704_v4  ;;  %v3710_v30 = vand.u32 4294901760, %v2983_v41  ;;  %v3711_v19 = vand.u32 4294901760, %v2988_v53 }
  0x5f   :  { %2425 = vsinq.f32 %v125_v20  ;;  %v3266_v63 = vpack.c.bf16 %v3709_v15, %v3708_v11  ;;  %vm135_vm9 = vcmp.eq.s32.totalorder %v130_v37, 2  ;;  %vm239_vm10 = vcmp.eq.s32.totalorder %v234_v12, 2 }
  0x60   :  { %v3272_v56 = vpack.c.bf16 %v3711_v19, %v3710_v30  ;;  %vm132_vm11 = vcmp.eq.s32.totalorder %v130_v37, 0  ;;  %vm236_vm12 = vcmp.eq.s32.totalorder %v234_v12, 0  ;;  %vm131_vm13 = vcmp.lt.s32.totalorder %v130_v37, 2 }
  0x61   :  { %vm235_vm14 = vcmp.lt.s32.totalorder %v234_v12, 2  ;;  %v3712_v62 = vand.u32 4294901760, %v2993_v34  ;;  %v3713_v1 = vand.u32 4294901760, %v2998_v35  ;;  %v3714_v26 = vand.u32 4294901760, %v3008_v16 }
  0x62   :  { %v3715_v28 = vand.u32 4294901760, %v3044_v40  ;;  %v3716_v35 = vand.u32 4294901760, %v3049_v33  ;;  %v3717_v48 = vand.u32 4294901760, %v3060_v47  ;;  %v3718_v16 = vand.u32 4294901760, %v3070_v38 }
  0x63   :  { %v3278_v51 = vpack.c.bf16 %v3713_v1, %v3712_v62  ;;  %v3719_v40 = vand.u32 4294901760, %v3084_v52  ;;  %v3720_v33 = vand.u32 4294901760, %v3089_v54  ;;  %v3721_v47 = vand.u32 4294901760, %v3112_v50  ;;  %v3726_v1 = vld [vmem:[#allocation19_spill] sm:$0xff] }
  0x64   :  { %v3285_v2 = vpack.c.bf16 %v3715_v28, %v3714_v26  ;;  %v3291_v37 = vpack.c.bf16 %v3717_v48, %v3716_v35  ;;  %v3722_v52 = vand.u32 4294901760, %v3117_v45  ;;  %v3724_v45 = vmov 0.0   ;;  %v3746_v26 = vld [vmem:[#allocation9_spill] sm:$0xff]  ;;  %v3747_v28 = vld [vmem:[#allocation10_spill] sm:$0xff] }
  0x65   :  { %v3301_v11 = vpack.c.bf16 %v3719_v40, %v3718_v16  ;;  %v3313_v19 = vpack.c.bf16 %v3721_v47, %v3720_v33  ;;  %v3754_v35 = vld [vmem:[#allocation17_spill] sm:$0xff] }
  0x68   :  { %v2424_v21 = vpop.eup %2423 }
  0x69   :  { %v2426_v18 = vpop.eup %2425  ;;  %v136_v43 = vxor.u32 2147483648, %v2424_v21 }
  0x6a   :  { %v133_v20 = vxor.u32 2147483648, %v2426_v18 }
  0x6b   :  { %v137_v41 = vsel %vm135_vm9, %v136_v43, %v2426_v18  ;;  %v241_v53 = vsel %vm239_vm10, %v136_v43, %v2426_v18  ;;  %v3723_v18 = vand.u32 4294901760, %v3122_v22  ;;  %v3725_v22 = vld [vmem:[#allocation18_spill] sm:$0xff] }
  0x6c   :  { %v134_v17 = vsel %vm132_vm11, %v2424_v21, %v133_v20  ;;  %v238_v61 = vsel %vm236_vm12, %v2424_v21, %v133_v20 }
  0x6d   :  { %v138_v4 = vsel %vm131_vm13, %v134_v17, %v137_v41  ;;  %v242_v7 = vsel %vm235_vm14, %v238_v61, %v241_v53  ;;  %v3321_v43 = vpack.c.bf16 %v3723_v18, %v3722_v52  ;;  %v3727_v41 = vld [vmem:[#allocation20_spill] sm:$0xff]  ;;  %v3748_v17 = vld [vmem:[#allocation11_spill] sm:$0xff] }
  0x6e   :  { %v139_v13 = vsel %vm129_vm15, nan, %v138_v4  ;;  %v243_v34 = vsel %vm129_vm15, nan, %v242_v7  ;;  %v3745_v53 = vld [vmem:[#allocation8_spill] sm:$0xff]  ;;  %v3750_v4 = vld [vmem:[#allocation13_spill] sm:$0xff]  ;;  %v3751_v7 = vld [vmem:[#allocation14_spill] sm:$0xff] }
  0x6f   :  { %v3293_v6 = vand.u32 4294901760, %v139_v13  ;;  %v3295_v12 = vand.u32 4294901760, %v243_v34  ;;  %v3749_v61 = vld [vmem:[#allocation12_spill] sm:$0xff] }
  0x71   :  { %v3304_v15 = vsub.f32 %v139_v13, %v3293_v6  ;;  %v3307_v30 = vsub.f32 %v243_v34, %v3295_v12  ;;  %v3752_v13 = vld [vmem:[#allocation15_spill] sm:$0xff]  ;;  %v3753_v34 = vld [vmem:[#allocation16_spill] sm:$0xff] }
  0x73   :  { %v375_v21 = vand.u32 4294901760, %v3304_v15  ;;  %v1232_v38 = vand.u32 4294901760, %v3307_v30 }
  0x75   :  { %v376_v20 = vsub.f32 %v3304_v15, %v375_v21  ;;  %v1233_v54 = vsub.f32 %v3307_v30, %v1232_v38 }
  0x77   :  { %v377_v50 = vand.u32 4294901760, %v376_v20  ;;  %v1234_v62 = vand.u32 4294901760, %v1233_v54 }
  0x79   :  { %378 = vmatmul.mubr.f32.vlgmr.msra.gmra.mrb[0].mxu0 %v377_v50  ;;  %1235 = vmatmul.mubr.f32.vlgmr.msra.gmra.mrb[0].mxu1 %v1234_v62 }
  0x7a   :  { %2043 = vmatpush1.bf16.msra.mxu0 %v2850_v42  ;;  %2235 = vmatpush1.bf16.msra.mxu1 %v2850_v42  ;;  %v3729_v42 = vld [vmem:[#allocation22_spill] sm:$0xff] }
  0x7b   :  { %2045 = vmatprep.subr.bf16.mxu0 %v2852_v5  ;;  %2237 = vmatprep.subr.bf16.mxu1 %v2852_v5  ;;  %v3728_v5 = vld [vmem:[#allocation21_spill] sm:$0xff] }
  0x7c   :  { %608 = vmatprep.mubr.f32.mxu0 %v3724_v45  ;;  %1465 = vmatprep.mubr.f32.mxu1 %v3724_v45 }
  0x7e   :  { %2047 = vmatpush1.bf16.msra.mxu0 %v3725_v22  ;;  %2239 = vmatpush1.bf16.msra.mxu1 %v3725_v22 }
  0x7f   :  { %2049 = vmatprep.subr.bf16.mxu0 %v3726_v1  ;;  %2241 = vmatprep.subr.bf16.mxu1 %v3726_v1 }
  0x82   :  { %2051 = vmatpush1.bf16.msra.mxu0 %v3727_v41  ;;  %2243 = vmatpush1.bf16.msra.mxu1 %v3727_v41 }
  0x83   :  { %2053 = vmatprep.subr.bf16.mxu0 %v2958_v24  ;;  %2245 = vmatprep.subr.bf16.mxu1 %v2958_v24  ;;  %v3730_v24 = vld [vmem:[#allocation23_spill] sm:$0xff] }
  0x86   :  { %2055 = vmatpush1.bf16.msra.mxu0 %v3027_v25  ;;  %2247 = vmatpush1.bf16.msra.mxu1 %v3027_v25  ;;  %v3732_v25 = vld [vmem:[#allocation25_spill] sm:$0xff] }
  0x87   :  { %2057 = vmatprep.subr.bf16.mxu0 %v3038_v39  ;;  %2249 = vmatprep.subr.bf16.mxu1 %v3038_v39  ;;  %v3733_v39 = vld [vmem:[#allocation26_spill] sm:$0xff] }
  0x8a   :  { %2059 = vmatpush1.bf16.msra.mxu0 %v3062_v55  ;;  %2251 = vmatpush1.bf16.msra.mxu1 %v3062_v55  ;;  %v3734_v55 = vld [vmem:[#allocation27_spill] sm:$0xff] }
  0x8b   :  { %2061 = vmatprep.subr.bf16.mxu0 %v3064_v29  ;;  %2253 = vmatprep.subr.bf16.mxu1 %v3064_v29  ;;  %v3735_v29 = vld [vmem:[#allocation28_spill] sm:$0xff] }
  0x8e   :  { %2063 = vmatpush1.bf16.msra.mxu0 %v3097_v27  ;;  %2255 = vmatpush1.bf16.msra.mxu1 %v3097_v27  ;;  %v3731_v27 = vld [vmem:[#allocation24_spill] sm:$0xff] }
  0x8f   :  { %2065 = vmatprep.subr.bf16.mxu0 %v3101_v59  ;;  %2257 = vmatprep.subr.bf16.mxu1 %v3101_v59  ;;  %v3736_v59 = vld [vmem:[#allocation29_spill] sm:$0xff] }
  0x92   :  { %2067 = vmatpush1.bf16.msra.mxu0 %v3128_v46  ;;  %2259 = vmatpush1.bf16.msra.mxu1 %v3128_v46  ;;  %v3737_v46 = vld [vmem:[#allocation30_spill] sm:$0xff] }
  0x93   :  { %2069 = vmatprep.subr.bf16.mxu0 %v3168_v31  ;;  %2261 = vmatprep.subr.bf16.mxu1 %v3168_v31  ;;  %v3740_v31 = vld [vmem:[#allocation3_spill] sm:$0xff] }
  0x96   :  { %2071 = vmatpush1.bf16.msra.mxu0 %v3174_v8  ;;  %2263 = vmatpush1.bf16.msra.mxu1 %v3174_v8  ;;  %v3743_v8 = vld [vmem:[#allocation6_spill] sm:$0xff] }
  0x97   :  { %2073 = vmatprep.subr.bf16.mxu0 %v3133_v3  ;;  %2265 = vmatprep.subr.bf16.mxu1 %v3133_v3  ;;  %v3739_v3 = vld [vmem:[#allocation2_spill] sm:$0xff] }
  0x99   :  { %610 = vmatmul.mubr.f32.vlgmr.msra.gmra.mrb[0].mxu0 %v3293_v6  ;;  %1467 = vmatmul.mubr.f32.vlgmr.msra.gmra.mrb[0].mxu1 %v3295_v12 }
  0x9a   :  { %2075 = vmatpush1.bf16.msra.mxu0 %v3728_v5  ;;  %2267 = vmatpush1.bf16.msra.mxu1 %v3728_v5 }
  0x9b   :  { %2077 = vmatprep.subr.bf16.mxu0 %v3729_v42  ;;  %2269 = vmatprep.subr.bf16.mxu1 %v3729_v42 }
  0x9c   :  { %744 = vmatprep.mubr.f32.mxu0 %v3724_v45  ;;  %1601 = vmatprep.mubr.f32.mxu1 %v3724_v45 }
  0x9e   :  { %2079 = vmatpush1.bf16.msra.mxu0 %v3730_v24  ;;  %2271 = vmatpush1.bf16.msra.mxu1 %v3730_v24 }
  0x9f   :  { %2081 = vmatprep.subr.bf16.mxu0 %v3731_v27  ;;  %2273 = vmatprep.subr.bf16.mxu1 %v3731_v27 }
  0xa2   :  { %2083 = vmatpush1.bf16.msra.mxu0 %v3162_v9  ;;  %2275 = vmatpush1.bf16.msra.mxu1 %v3162_v9  ;;  %v3742_v9 = vld [vmem:[#allocation5_spill] sm:$0xff] }
  0xa3   :  { %2085 = vmatprep.subr.bf16.mxu0 %v3166_v32  ;;  %2277 = vmatprep.subr.bf16.mxu1 %v3166_v32  ;;  %v3738_v32 = vld [vmem:[#allocation31_spill] sm:$0xff] }
  0xa6   :  { %2087 = vmatpush1.bf16.msra.mxu0 %v3172_v14  ;;  %2279 = vmatpush1.bf16.msra.mxu1 %v3172_v14  ;;  %v3741_v14 = vld [vmem:[#allocation4_spill] sm:$0xff] }
  0xa7   :  { %2089 = vmatprep.subr.bf16.mxu0 %v3732_v25  ;;  %2281 = vmatprep.subr.bf16.mxu1 %v3732_v25 }
  0xaa   :  { %2091 = vmatpush1.bf16.msra.mxu0 %v3733_v39  ;;  %2283 = vmatpush1.bf16.msra.mxu1 %v3733_v39 }
  0xab   :  { %2093 = vmatprep.subr.bf16.mxu0 %v3734_v55  ;;  %2285 = vmatprep.subr.bf16.mxu1 %v3734_v55 }
  0xae   :  { %2095 = vmatpush1.bf16.msra.mxu0 %v3735_v29  ;;  %2287 = vmatpush1.bf16.msra.mxu1 %v3735_v29 }
  0xaf   :  { %2097 = vmatprep.subr.bf16.mxu0 %v3736_v59  ;;  %2289 = vmatprep.subr.bf16.mxu1 %v3736_v59 }
  0xb2   :  { %2099 = vmatpush1.bf16.msra.mxu0 %v3737_v46  ;;  %2291 = vmatpush1.bf16.msra.mxu1 %v3737_v46 }
  0xb3   :  { %2101 = vmatprep.subr.bf16.mxu0 %v3738_v32  ;;  %2293 = vmatprep.subr.bf16.mxu1 %v3738_v32 }
  0xb6   :  { %2103 = vmatpush1.bf16.msra.mxu0 %v3206_v36  ;;  %2295 = vmatpush1.bf16.msra.mxu1 %v3206_v36  ;;  %v3744_v36 = vld [vmem:[#allocation7_spill] sm:$0xff] }
  0xb7   :  { %2105 = vmatprep.subr.bf16.mxu0 %v3739_v3  ;;  %2297 = vmatprep.subr.bf16.mxu1 %v3739_v3 }
  0xb9   :  { %747 = vmatmul.mubr.f32.vlgmr.msra.gmra.mrb[0].mxu0 %v3304_v15  ;;  %1604 = vmatmul.mubr.f32.vlgmr.msra.gmra.mrb[0].mxu1 %v3307_v30 }
  0xba   :  { %2107 = vmatpush1.bf16.msra.mxu0 %v3740_v31  ;;  %2299 = vmatpush1.bf16.msra.mxu1 %v3740_v31 }
  0xbb   :  { %2109 = vmatprep.subr.bf16.mxu0 %v3741_v14  ;;  %2301 = vmatprep.subr.bf16.mxu1 %v3741_v14 }
  0xbc   :  { %849 = vmatprep.mubr.f32.mxu0 %v3724_v45  ;;  %1706 = vmatprep.mubr.f32.mxu1 %v3724_v45 }
  0xbe   :  { %2111 = vmatpush1.bf16.msra.mxu0 %v3742_v9  ;;  %2303 = vmatpush1.bf16.msra.mxu1 %v3742_v9 }
  0xbf   :  { %2113 = vmatprep.subr.bf16.mxu0 %v3743_v8  ;;  %2305 = vmatprep.subr.bf16.mxu1 %v3743_v8 }
  0xc2   :  { %2115 = vmatpush1.bf16.msra.mxu0 %v3744_v36  ;;  %2307 = vmatpush1.bf16.msra.mxu1 %v3744_v36 }
  0xc3   :  { %2117 = vmatprep.subr.bf16.mxu0 %v3745_v53  ;;  %2309 = vmatprep.subr.bf16.mxu1 %v3745_v53 }
  0xc6   :  { %2119 = vmatpush1.bf16.msra.mxu0 %v3746_v26  ;;  %2311 = vmatpush1.bf16.msra.mxu1 %v3746_v26 }
  0xc7   :  { %2121 = vmatprep.subr.bf16.mxu0 %v3747_v28  ;;  %2313 = vmatprep.subr.bf16.mxu1 %v3747_v28 }
  0xca   :  { %2123 = vmatpush1.bf16.msra.mxu0 %v3748_v17  ;;  %2315 = vmatpush1.bf16.msra.mxu1 %v3748_v17 }
  0xcb   :  { %2125 = vmatprep.subr.bf16.mxu0 %v3749_v61  ;;  %2317 = vmatprep.subr.bf16.mxu1 %v3749_v61 }
  0xce   :  { %2127 = vmatpush1.bf16.msra.mxu0 %v3750_v4  ;;  %2319 = vmatpush1.bf16.msra.mxu1 %v3750_v4 }
  0xcf   :  { %2129 = vmatprep.subr.bf16.mxu0 %v3751_v7  ;;  %2321 = vmatprep.subr.bf16.mxu1 %v3751_v7 }
  0xd2   :  { %2131 = vmatpush1.bf16.msra.mxu0 %v3752_v13  ;;  %2323 = vmatpush1.bf16.msra.mxu1 %v3752_v13 }
  0xd3   :  { %2133 = vmatprep.subr.bf16.mxu0 %v3753_v34  ;;  %2325 = vmatprep.subr.bf16.mxu1 %v3753_v34 }
  0xd6   :  { %2135 = vmatpush1.bf16.msra.mxu0 %v3754_v35  ;;  %2327 = vmatpush1.bf16.msra.mxu1 %v3754_v35 }
  0xd7   :  { %2137 = vmatprep.subr.bf16.mxu0 %v3213_v58  ;;  %2329 = vmatprep.subr.bf16.mxu1 %v3213_v58 }
  0xd9   :  { %853 = vmatmul.mubr.f32.vlgmr.msra.gmra.mrb[0].mxu0 %v375_v21  ;;  %1710 = vmatmul.mubr.f32.vlgmr.msra.gmra.mrb[0].mxu1 %v1232_v38 }
  0xda   :  { %2139 = vmatpush1.bf16.msra.mxu0 %v3219_v10  ;;  %2331 = vmatpush1.bf16.msra.mxu1 %v3219_v10 }
  0xdb   :  { %2141 = vmatprep.subr.bf16.mxu0 %v3229_v60  ;;  %2333 = vmatprep.subr.bf16.mxu1 %v3229_v60 }
  0xdc   :  { %1019 = vmatprep.mubr.f32.mxu0 %v3724_v45  ;;  %1876 = vmatprep.mubr.f32.mxu1 %v3724_v45 }
  0xde   :  { %2143 = vmatpush1.bf16.msra.mxu0 %v3235_v23  ;;  %2335 = vmatpush1.bf16.msra.mxu1 %v3235_v23 }
  0xdf   :  { %2145 = vmatprep.subr.bf16.mxu0 %v3242_v49  ;;  %2337 = vmatprep.subr.bf16.mxu1 %v3242_v49 }
  0xe2   :  { %2147 = vmatpush1.bf16.msra.mxu0 %v3248_v44  ;;  %2339 = vmatpush1.bf16.msra.mxu1 %v3248_v44 }
  0xe3   :  { %2149 = vmatprep.subr.bf16.mxu0 %v3254_v57  ;;  %2341 = vmatprep.subr.bf16.mxu1 %v3254_v57 }
  0xe6   :  { %2151 = vmatpush1.bf16.msra.mxu0 %v3260_v0  ;;  %2343 = vmatpush1.bf16.msra.mxu1 %v3260_v0 }
  0xe7   :  { %2153 = vmatprep.subr.bf16.mxu0 %v3266_v63  ;;  %2345 = vmatprep.subr.bf16.mxu1 %v3266_v63 }
  0xea   :  { %2155 = vmatpush1.bf16.msra.mxu0 %v3272_v56  ;;  %2347 = vmatpush1.bf16.msra.mxu1 %v3272_v56 }
  0xeb   :  { %2157 = vmatprep.subr.bf16.mxu0 %v3278_v51  ;;  %2349 = vmatprep.subr.bf16.mxu1 %v3278_v51 }
  0xee   :  { %2159 = vmatpush1.bf16.msra.mxu0 %v3285_v2  ;;  %2351 = vmatpush1.bf16.msra.mxu1 %v3285_v2 }
  0xef   :  { %2161 = vmatprep.subr.bf16.mxu0 %v3291_v37  ;;  %2353 = vmatprep.subr.bf16.mxu1 %v3291_v37 }
  0xf2   :  { %2163 = vmatpush1.bf16.msra.mxu0 %v3301_v11  ;;  %2355 = vmatpush1.bf16.msra.mxu1 %v3301_v11 }
  0xf3   :  { %2165 = vmatprep.subr.bf16.mxu0 %v3313_v19  ;;  %2357 = vmatprep.subr.bf16.mxu1 %v3313_v19 }
  0xf6   :  { %2167 = vmatpush1.bf16.msra.mxu0 %v3321_v43  ;;  %2359 = vmatpush1.bf16.msra.mxu1 %v3321_v43 }
  0xf7   :  { %2169 = vmatprep.subr.bf16.mxu0 %v3739_v3  ;;  %2361 = vmatprep.subr.bf16.mxu1 %v3739_v3 }
  0xf9   :  { %1021 = vmatmul.mubr.f32.vlgmr.msra.gmra.mrb[0].mxu0 %v3293_v6  ;;  %1878 = vmatmul.mubr.f32.vlgmr.msra.gmra.mrb[0].mxu1 %v3295_v12 }
  0xfa   :  { %2171 = vmatpush1.bf16.msra.mxu0 %v3740_v31  ;;  %2363 = vmatpush1.bf16.msra.mxu1 %v3740_v31 }
  0xfb   :  { %2173 = vmatprep.subr.bf16.mxu0 %v3741_v14  ;;  %2365 = vmatprep.subr.bf16.mxu1 %v3741_v14 }
  0xfc   :  { %1123 = vmatprep.mubr.f32.mxu0 %v3724_v45  ;;  %1980 = vmatprep.mubr.f32.mxu1 %v3724_v45 }
  0xfe   :  { %2175 = vmatpush1.bf16.msra.mxu0 %v3742_v9  ;;  %2367 = vmatpush1.bf16.msra.mxu1 %v3742_v9 }
  0xff   :  { %2177 = vmatprep.subr.bf16.mxu0 %v3743_v8  ;;  %2369 = vmatprep.subr.bf16.mxu1 %v3743_v8 }
 0x102   :  { %2179 = vmatpush1.bf16.msra.mxu0 %v3744_v36  ;;  %2371 = vmatpush1.bf16.msra.mxu1 %v3744_v36 }
 0x103   :  { %2181 = vmatprep.subr.bf16.mxu0 %v3745_v53  ;;  %2373 = vmatprep.subr.bf16.mxu1 %v3745_v53 }
 0x106   :  { %2183 = vmatpush1.bf16.msra.mxu0 %v3746_v26  ;;  %2375 = vmatpush1.bf16.msra.mxu1 %v3746_v26 }
 0x107   :  { %2185 = vmatprep.subr.bf16.mxu0 %v3747_v28  ;;  %2377 = vmatprep.subr.bf16.mxu1 %v3747_v28 }
 0x10a   :  { %2187 = vmatpush1.bf16.msra.mxu0 %v3748_v17  ;;  %2379 = vmatpush1.bf16.msra.mxu1 %v3748_v17 }
 0x10b   :  { %2189 = vmatprep.subr.bf16.mxu0 %v3749_v61  ;;  %2381 = vmatprep.subr.bf16.mxu1 %v3749_v61 }
 0x10e   :  { %2191 = vmatpush1.bf16.msra.mxu0 %v3750_v4  ;;  %2383 = vmatpush1.bf16.msra.mxu1 %v3750_v4 }
 0x10f   :  { %2193 = vmatprep.subr.bf16.mxu0 %v3751_v7  ;;  %2385 = vmatprep.subr.bf16.mxu1 %v3751_v7 }
 0x112   :  { %2195 = vmatpush1.bf16.msra.mxu0 %v3752_v13  ;;  %2387 = vmatpush1.bf16.msra.mxu1 %v3752_v13 }
 0x113   :  { %2197 = vmatprep.subr.bf16.mxu0 %v3753_v34  ;;  %2389 = vmatprep.subr.bf16.mxu1 %v3753_v34 }
 0x116   :  { %2199 = vmatpush1.bf16.msra.mxu0 %v3754_v35  ;;  %2391 = vmatpush1.bf16.msra.mxu1 %v3754_v35 }
 0x119   :  { %1125 = vmatmul.mubr.f32.vlgmr.msra.gmra.mrb[0].mxu0 %v3293_v6  ;;  %1982 = vmatmul.mubr.f32.vlgmr.msra.gmra.mrb[0].mxu1 %v3295_v12 }
 0x1ec   :  { %v1126_v10 = vpop.f32.mrb[0].mxu0  ;;  %v1983_v58 = vpop.f32.mrb[0].mxu1 }
 0x1ed   :  { %1131 = vst [vmem:[%s3524_s3] sm:$0xff] %v1126_v10  ;;  %1988 = vst [vmem:[%s3525_s4] sm:$0xff] %v1983_v58  ;;  %v1128_v60 = vpop.f32.mrb[1].mxu0  ;;  %v1985_v23 = vpop.f32.mrb[1].mxu1 }
 0x1ee   :  { %1132 = vst [vmem:[%s3524_s3 + $0x8] sm:$0xff] %v1128_v60  ;;  %1989 = vst [vmem:[%s3525_s4 + $0x8] sm:$0xff] %v1985_v23 }

</bundles_post_ra>
